<compile_context>
chip_gen: v5e
topology: v5e:2x2
jax: 0.10.0
libtpu: 0.0.40
codegen_flags: <defaults>
</compile_context>

<pallas_src>
import jax
import jax.numpy as jnp
from jax import lax
from jax.experimental import pallas as pl
from jax.experimental.pallas import tpu as pltpu

DROPOUT = 0.2  # unused in eval-mode forward


def _round_up(x, m):
    return (x + m - 1) // m * m


def _pad2(a, rows, cols):
    pr, pc = rows - a.shape[0], cols - a.shape[1]
    if pr == 0 and pc == 0:
        return a
    return jnp.pad(a, ((0, pr), (0, pc)))


def _vmem_budget_bytes():
    """Per-generation usable-VMEM target for tile selection / vmem_limit_bytes."""
    cap = 128 << 20
    try:
        info = pltpu.get_tpu_info()
        cap = int(getattr(info, "vmem_capacity_bytes", cap))
    except Exception:
        pass
    if cap >= (96 << 20):        # v5e / v6e: 128 MiB physical
        return 100 << 20
    return (cap * 4) // 5        # v7x: ~51 MiB of 64 MiB, keep spill headroom


def ffn_kernel(x_ref, w1_ref, b1_ref, w2_ref, b2_ref, o_ref, acc_ref):
    # x_ref:  (tm, Dp)          w1_ref: (th, Dp)  (W1 pre-transposed row slab)
    # b1_ref: (1, th)           w2_ref: (th, Dp)   b2_ref: (1, Dp)
    # o_ref:  (tm, Dp)          acc_ref: (tm, Dp) f32
    h_idx = pl.program_id(1)

    @pl.when(h_idx == 0)
    def _():
        acc_ref[...] = jnp.zeros_like(acc_ref)

    # Fused: first-matmul tile (contract over D against the transposed W1 slab)
    # + bias + ReLU, then partial second matmul into the f32 accumulator.
    # Hidden activation stays at (tm, th), never (tm, H).
    hid = lax.dot_general(
        x_ref[...], w1_ref[...],
        dimension_numbers=(((1,), (1,)), ((), ())),
        preferred_element_type=jnp.float32)              # (tm, th)
    hid = jnp.maximum(hid + b1_ref[...], 0.0)
    acc_ref[...] += jnp.dot(hid.astype(w2_ref.dtype), w2_ref[...],
                            preferred_element_type=jnp.float32)

    @pl.when(h_idx == pl.num_programs(1) - 1)
    def _():
        o_ref[...] = (acc_ref[...] + b2_ref[...]).astype(o_ref.dtype)


def prepare_params(w1, b1, w2, b2, *, dtype=None):
    """One-time padding / transpose of the FFN weights into kernel layout.

    w1: (D, H), b1: (H,) or (1, H), w2: (H, D), b2: (D,) or (1, D).
    Pads feature dims to multiples of 128 and stores W1 transposed to (Hp, Dp)
    so both weight tiles are contiguous row slabs.  Call once, reuse per forward.
    """
    D, H = w1.shape
    Dp = _round_up(D, 128)
    Hp = _round_up(H, 128)
    if dtype is not None:
        w1, b1, w2, b2 = (a.astype(dtype) for a in (w1, b1, w2, b2))
    w1t = _pad2(jnp.transpose(w1), Hp, Dp)          # (Hp, Dp)
    b1p = _pad2(b1.reshape(1, -1), 1, Hp)
    w2p = _pad2(w2, Hp, Dp)                         # (Hp, Dp)
    b2p = _pad2(b2.reshape(1, -1), 1, Dp)
    return dict(w1t=w1t, b1=b1p, w2=w2p, b2=b2p, D=D, H=H, Dp=Dp, Hp=Hp)


def feed_forward(x, params, *, tm=512, th=1024):
    """Eval-mode FeedForward.  x: (B, T, D); params from prepare_params().

    tm: token-tile target (>=512 keeps the weight stream above the HBM break-even
        on v5e/v6e/v7x; kept 128-aligned, multiples of 256 feed the 256x256 MXU).
    th: hidden-tile target; only used when the weights can't stay VMEM-resident.
    """
    B, T, D = x.shape
    M = B * T
    assert D == params["D"], "x feature dim does not match prepared params"
    Dp, Hp = params["Dp"], params["Hp"]
    w1t, b1p, w2p, b2p = params["w1t"], params["b1"], params["w2"], params["b2"]

    budget = _vmem_budget_bytes()
    wsize = w1t.dtype.itemsize
    xsize = x.dtype.itemsize

    # ---- token tile ---------------------------------------------------------
    tm = min(tm, _round_up(M, 8))            # shrink for tiny inputs
    if tm >= 128:
        tm = _round_up(tm, 128)
    # Megacore guard (v7x): make sure the "parallel" token axis has >= 2 steps.
    if M > 256 and pl.cdiv(M, tm) == 1:
        tm = max(256, _round_up(pl.cdiv(M, 2), 128))

    def footprint(tm_, th_):
        return (2 * tm_ * Dp * xsize         # x tiles (double-buffered)
                + 2 * th_ * Dp * wsize       # W1 row tiles
                + 2 * th_ * Dp * wsize       # W2 row tiles
                + 2 * (th_ + Dp) * wsize     # biases
                + tm_ * Dp * 4               # f32 accumulator
                + 2 * tm_ * Dp * xsize)      # output tiles

    # Shrink tm only as a last resort (it carries the weight-reuse AI).
    while tm > 128 and footprint(tm, 128) > budget:
        tm = max(128, (tm // 2) // 128 * 128)
    Mp = _round_up(M, tm)
    grid_m = Mp // tm

    # ---- hidden tile: prefer full weight residency --------------------------
    if footprint(tm, Hp) <= budget:
        th = Hp          # weight block indices grid-constant -> DMA'd once total
    else:
        q = Hp // 128
        best = 128
        for d in range(1, q + 1):            # th must divide Hp: no zero-padding work
            if q % d == 0:
                cand = 128 * d
                if cand <= max(th, 128) and footprint(tm, cand) <= budget:
                    best = max(best, cand)
        th = best
    grid_h = Hp // th
    grid = (grid_m, grid_h)

    vmem_limit = int(min(budget, max(16 << 20, (footprint(tm, th) * 3) // 2)))

    weight_reads = 1 if grid_h == 1 else grid_m      # resident weights read once
    cost = pl.CostEstimate(
        flops=4 * Mp * Dp * Hp,
        transcendentals=0,
        bytes_accessed=int(weight_reads * (w1t.size + w2p.size) * wsize
                           + (b1p.size + b2p.size) * wsize
                           + 2 * Mp * Dp * xsize),   # x read + padded out write
    )

    x2 = _pad2(x.reshape(M, D), Mp, Dp)

    out2 = pl.pallas_call(
        ffn_kernel,
        out_shape=jax.ShapeDtypeStruct((Mp, Dp), x.dtype),
        grid_spec=pltpu.PrefetchScalarGridSpec(
            num_scalar_prefetch=0,
            grid=grid,
            in_specs=[
                pl.BlockSpec((tm, Dp), lambda i, h: (i, 0)),   # x tile (resident over h)
                pl.BlockSpec((th, Dp), lambda i, h: (h, 0)),   # W1^T row slab (contiguous)
                pl.BlockSpec((1, th), lambda i, h: (0, h)),    # b1 tile
                pl.BlockSpec((th, Dp), lambda i, h: (h, 0)),   # W2 row slab
                pl.BlockSpec((1, Dp), lambda i, h: (0, 0)),    # b2 (grid-invariant)
            ],
            out_specs=pl.BlockSpec((tm, Dp), lambda i, h: (i, 0)),
            scratch_shapes=[pltpu.VMEM((tm, Dp), jnp.float32)],
        ),
        compiler_params=pltpu.CompilerParams(
            dimension_semantics=("parallel", "arbitrary"),
            vmem_limit_bytes=vmem_limit,
        ),
        cost_estimate=cost,
    )(x2, w1t, b1p, w2p, b2p)

    return out2[:M, :D].reshape(B, T, D)


def init_params(key, n_embed, scale_factor=1):
    """Deterministic init mimicking torch.nn.Linear default U(-1/sqrt(fan_in), 1/sqrt(fan_in))."""
    hidden = scale_factor * n_embed
    k1, k2, k3, k4 = jax.random.split(key, 4)
    bound1 = 1.0 / jnp.sqrt(n_embed)
    bound2 = 1.0 / jnp.sqrt(hidden)
    # stored as (in_features, out_features) so the reference uses x @ W
    w1 = jax.random.uniform(k1, (n_embed, hidden), jnp.float32, -bound1, bound1)
    b1 = jax.random.uniform(k2, (1, hidden), jnp.float32, -bound1, bound1)
    w2 = jax.random.uniform(k3, (hidden, n_embed), jnp.float32, -bound2, bound2)
    b2 = jax.random.uniform(k4, (1, n_embed), jnp.float32, -bound2, bound2)
    return w1, b1, w2, b2


if __name__ == "__main__":
    key = jax.random.PRNGKey(0)
    B, T, n_embed, scale_factor = 2, 8, 32, 1

    kx, kp = jax.random.split(key)
    x = jax.random.normal(kx, (B, T, n_embed), jnp.float32)
    w1, b1, w2, b2 = init_params(kp, n_embed, scale_factor)

    # pure-JAX reference (eval-mode dropout = identity)
    ref = jnp.maximum(x.reshape(-1, n_embed) @ w1 + b1, 0.0) @ w2 + b2
    ref = ref.reshape(B, T, n_embed)

    # f32 path
    params_f32 = prepare_params(w1, b1, w2, b2)
    out = jax.block_until_ready(feed_forward(x, params_f32))
    assert out.shape == (B, T, n_embed)
    assert jnp.allclose(out, ref, atol=1e-5, rtol=1e-4), "f32 mismatch vs reference"

    # bf16 path (bf16 activations/weights for v6e/v7x MXU, f32 accumulation)
    params_bf16 = prepare_params(w1, b1, w2, b2, dtype=jnp.bfloat16)
    out_bf16 = jax.block_until_ready(
        feed_forward(x.astype(jnp.bfloat16), params_bf16))
    assert out_bf16.dtype == jnp.bfloat16
    assert jnp.allclose(out_bf16.astype(jnp.float32), ref, atol=5e-2, rtol=5e-2), \
        "bf16 mismatch vs reference"

    print("KERNEL_OK")
</pallas_src>

<mosaic_0001>
module attributes {stable_mosaic.version = 11 : i64} {
  func.func @ffn_kernel(%arg0: i32, %arg1: i32, %arg2: memref<16x128xf32, #tpu.memory_space<vmem>>, %arg3: memref<128x128xf32, #tpu.memory_space<vmem>>, %arg4: memref<1x128xf32, #tpu.memory_space<vmem>>, %arg5: memref<128x128xf32, #tpu.memory_space<vmem>>, %arg6: memref<1x128xf32, #tpu.memory_space<vmem>>, %arg7: memref<16x128xf32, #tpu.memory_space<vmem>>, %arg8: memref<16x128xf32, #tpu.memory_space<vmem>>) attributes {dimension_semantics = [#tpu.dimension_semantics<parallel>, #tpu.dimension_semantics<arbitrary>], iteration_bounds = array<i64: 1, 1>, scalar_prefetch = 0 : i64, scratch_operands = 1 : i64, tpu.core_type = #tpu.core_type<tc>, window_params = [{transform_indices = @transform_0, window_bounds = array<i64: 16, 128>}, {transform_indices = @transform_1, window_bounds = array<i64: 128, 128>}, {transform_indices = @transform_2, window_bounds = array<i64: 1, 128>}, {transform_indices = @transform_3, window_bounds = array<i64: 128, 128>}, {pipeline_mode = #tpu.pipeline_mode<synchronous>, transform_indices = @transform_4, window_bounds = array<i64: 1, 128>}, {transform_indices = @transform_5, window_bounds = array<i64: 16, 128>}]} {
    %c0_i32 = arith.constant 0 : i32
    %0 = arith.cmpi eq, %arg1, %c0_i32 : i32
    %1 = arith.extui %0 : i1 to i32
    %c0_i32_0 = arith.constant 0 : i32
    %2 = arith.cmpi ne, %1, %c0_i32_0 : i32
    scf.if %2 {
      %cst_16 = arith.constant 0.000000e+00 : f32
      %19 = vector.broadcast %cst_16 : f32 to vector<16x128xf32>
      %c0_17 = arith.constant 0 : index
      %c0_18 = arith.constant 0 : index
      %20 = vector.load %arg8[%c0_17, %c0_18] : memref<16x128xf32, #tpu.memory_space<vmem>>, vector<16x128xf32>
      tpu.vector_store %arg8[%c0_17, %c0_18], %19 {strides = array<i32>} : memref<16x128xf32, #tpu.memory_space<vmem>>, vector<16x128xf32>,
    } else {
    }
    %c0 = arith.constant 0 : index
    %c0_1 = arith.constant 0 : index
    %3 = vector.load %arg2[%c0, %c0_1] : memref<16x128xf32, #tpu.memory_space<vmem>>, vector<16x128xf32>
    %c0_2 = arith.constant 0 : index
    %c0_3 = arith.constant 0 : index
    %4 = vector.load %arg3[%c0_2, %c0_3] : memref<128x128xf32, #tpu.memory_space<vmem>>, vector<128x128xf32>
    %cst = arith.constant dense<0.000000e+00> : vector<16x128xf32>
    %5 = tpu.matmul %3, %4, %cst {dimension_numbers = #tpu.dot_dimension_numbers<[1], [1], [0], [0], [0, 0, 1, 0], [], []>} : vector<16x128xf32>, vector<128x128xf32>, vector<16x128xf32> -> vector<16x128xf32>
    %c0_4 = arith.constant 0 : index
    %c0_5 = arith.constant 0 : index
    %6 = vector.load %arg4[%c0_4, %c0_5] : memref<1x128xf32, #tpu.memory_space<vmem>>, vector<1x128xf32>
    %7 = vector.broadcast %6 : vector<1x128xf32> to vector<16x128xf32>
    %8 = arith.addf %5, %7 : vector<16x128xf32>
    %cst_6 = arith.constant 0.000000e+00 : f32
    %9 = vector.broadcast %cst_6 : f32 to vector<16x128xf32>
    %10 = arith.maximumf %8, %9 : vector<16x128xf32>
    %c0_7 = arith.constant 0 : index
    %c0_8 = arith.constant 0 : index
    %11 = vector.load %arg8[%c0_7, %c0_8] : memref<16x128xf32, #tpu.memory_space<vmem>>, vector<16x128xf32>
    %c0_9 = arith.constant 0 : index
    %c0_10 = arith.constant 0 : index
    %12 = vector.load %arg5[%c0_9, %c0_10] : memref<128x128xf32, #tpu.memory_space<vmem>>, vector<128x128xf32>
    %cst_11 = arith.constant dense<0.000000e+00> : vector<16x128xf32>
    %13 = tpu.matmul %10, %12, %cst_11 {dimension_numbers = #tpu.dot_dimension_numbers<[1], [0], [0], [1], [0, 0, 1, 1], [], []>} : vector<16x128xf32>, vector<128x128xf32>, vector<16x128xf32> -> vector<16x128xf32>
    %14 = arith.addf %11, %13 : vector<16x128xf32>
    %c0_12 = arith.constant 0 : index
    %c0_13 = arith.constant 0 : index
    %15 = vector.load %arg8[%c0_12, %c0_13] : memref<16x128xf32, #tpu.memory_space<vmem>>, vector<16x128xf32>
    tpu.vector_store %arg8[%c0_12, %c0_13], %14 {strides = array<i32>} : memref<16x128xf32, #tpu.memory_space<vmem>>, vector<16x128xf32>,
    %c0_i32_14 = arith.constant 0 : i32
    %16 = arith.cmpi eq, %arg1, %c0_i32_14 : i32
    %17 = arith.extui %16 : i1 to i32
    %c0_i32_15 = arith.constant 0 : i32
    %18 = arith.cmpi ne, %17, %c0_i32_15 : i32
    scf.if %18 {
      %c0_16 = arith.constant 0 : index
      %c0_17 = arith.constant 0 : index
      %19 = vector.load %arg8[%c0_16, %c0_17] : memref<16x128xf32, #tpu.memory_space<vmem>>, vector<16x128xf32>
      %c0_18 = arith.constant 0 : index
      %c0_19 = arith.constant 0 : index
      %20 = vector.load %arg6[%c0_18, %c0_19] : memref<1x128xf32, #tpu.memory_space<vmem>>, vector<1x128xf32>
      %21 = vector.broadcast %20 : vector<1x128xf32> to vector<16x128xf32>
      %22 = arith.addf %19, %21 : vector<16x128xf32>
      %c0_20 = arith.constant 0 : index
      %c0_21 = arith.constant 0 : index
      %23 = vector.load %arg7[%c0_20, %c0_21] : memref<16x128xf32, #tpu.memory_space<vmem>>, vector<16x128xf32>
      tpu.vector_store %arg7[%c0_20, %c0_21], %22 {strides = array<i32>} : memref<16x128xf32, #tpu.memory_space<vmem>>, vector<16x128xf32>,
    } else {
    }
    return
  }
  func.func @transform_0(%arg0: i32, %arg1: i32) -> (i32, i32) {
    %c0_i32 = arith.constant 0 : i32
    %c0_i32_0 = arith.constant 0 : i32
    return %arg0, %c0_i32 : i32, i32
  }
  func.func @transform_1(%arg0: i32, %arg1: i32) -> (i32, i32) {
    %c0_i32 = arith.constant 0 : i32
    %c0_i32_0 = arith.constant 0 : i32
    return %arg1, %c0_i32 : i32, i32
  }
  func.func @transform_2(%arg0: i32, %arg1: i32) -> (i32, i32) {
    %c0_i32 = arith.constant 0 : i32
    %c0_i32_0 = arith.constant 0 : i32
    return %c0_i32, %arg1 : i32, i32
  }
  func.func @transform_3(%arg0: i32, %arg1: i32) -> (i32, i32) {
    %c0_i32 = arith.constant 0 : i32
    %c0_i32_0 = arith.constant 0 : i32
    return %arg1, %c0_i32 : i32, i32
  }
  func.func @transform_4(%arg0: i32, %arg1: i32) -> (i32, i32) {
    %c0_i32 = arith.constant 0 : i32
    %c0_i32_0 = arith.constant 0 : i32
    %c0_i32_1 = arith.constant 0 : i32
    return %c0_i32, %c0_i32_0 : i32, i32
  }
  func.func @transform_5(%arg0: i32, %arg1: i32) -> (i32, i32) {
    %c0_i32 = arith.constant 0 : i32
    %c0_i32_0 = arith.constant 0 : i32
    return %arg0, %c0_i32 : i32, i32
  }
}

</mosaic_0001>

<bundles_post_ra>
// kernel: tpu_custom_call.1
= control target key start
LH: loop header
LB: loop body
LE: loop exit
PB: predicated region body
PF: predicated region fallthrough
CT: control target
= control target key end

     0   :  { %10 = vsyncpa [#allocation4], 0  ;;  %s391_s0 = inlined_call_operand.hbm [shape: f32[16,128], index: 0, kind: input, shape index: {}]   ;;  %s392_s1 = inlined_call_operand.hbm [shape: f32[128,128], index: 1, kind: input, shape index: {}]   ;;  %s393_s2 = inlined_call_operand.vmem [shape: f32[1,128], index: 2, kind: input, shape index: {}]   ;;  %s394_s3 = inlined_call_operand.hbm [shape: f32[128,128], index: 3, kind: input, shape index: {}]   ;;  %s395_s4 = inlined_call_operand.vmem [shape: f32[1,128], index: 4, kind: input, shape index: {}]   ;;  %s396_s5 = inlined_call_operand.hbm [shape: f32[16,128], index: 5, kind: output, shape index: {}]  }
   0x1   :  { %11 = vsyncpa [#allocation7], 0 }
   0x2   :  { %12 = vsyncpa [#allocation5], 0  ;;  %s30_s20 = sshll.u32 %s392_s1, 4  ;;  %s325_s21 = smov [#allocation6]   ;;  %s31_s20 = int_to_ptr.hbm [resolvable:$true] %s30_s20 }
   0x3   :  { %s32_s22 = sshll.u32 %s325_s21, 4  ;;  %s17_s25 = sshll.u32 %s391_s0, 4  ;;  %s33_s22 = int_to_ptr.vmem [resolvable:$true] %s32_s22  ;;  %s18_s25 = int_to_ptr.hbm [resolvable:$true] %s17_s25 }
   0x4   :  { %s326_s26 = smov 128   ;;  %s327_s27 = smov 8  }
   0x5   :  { %38 = dma.hbm_to_vmem [thread:$0]  %s31_s20, 2048, %s33_s22, [#allocation7], %s326_s26, %s326_s26, %s327_s27  }
   0x6   :  { %s328_s28 = smov [#allocation3]   ;;  %s45_s1 = sshll.u32 %s394_s3, 4  ;;  %s46_s1 = int_to_ptr.hbm [resolvable:$true] %s45_s1 }
   0x7   :  { %s19_s29 = sshll.u32 %s328_s28, 4  ;;  %s329_s0 = smov [#allocation8]   ;;  %s20_s29 = int_to_ptr.vmem [resolvable:$true] %s19_s29 }
   0x8   :  { %25 = dma.hbm_to_vmem [thread:$0]  %s18_s25, 256, %s20_s29, [#allocation4], %s326_s26, %s326_s26, %s327_s27  }
   0x9   :  { %s47_s7 = sshll.u32 %s329_s0, 4  ;;  %s48_s7 = int_to_ptr.vmem [resolvable:$true] %s47_s7 }
   0xa   :  { %53 = dma.hbm_to_vmem [thread:$0]  %s46_s1, 2048, %s48_s7, [#allocation7], %s326_s26, %s326_s26, %s327_s27  }
   0xb   :  { %319 = dma.done.wait [#allocation4], 256  }
   0xc   :  { %320 = vsyncadd [#allocation4], 4294967040 }
   0xd   :  { %321 = dma.done.wait [#allocation7], 4096  }
   0xe   :  { %322 = vsyncadd [#allocation7], 4294963200  ;;  %v91_v0 = vld [vmem:[#allocation6 + $0x78] sm:$0xff]  ;;  %v90_v1 = vld [vmem:[#allocation6 + $0x70] sm:$0xff]  ;;  %s330_s11 = smov [#allocation9]  }
   0xf   :  { %96 = vmatpush.xpose.msra.mxu0 %v91_v0  ;;  %199 = vmatpush.xpose.msra.mxu2 %v91_v0  ;;  %v89_v2 = vld [vmem:[#allocation6 + $0x68] sm:$0xff]  ;;  %v88_v3 = vld [vmem:[#allocation6 + $0x60] sm:$0xff]  ;;  %v87_v4 = vld [vmem:[#allocation6 + $0x58] sm:$0xff]  ;;  %s183_s12 = sshll.u32 %s330_s11, 4  ;;  %s184_s12 = int_to_ptr.vmem [resolvable:$true] %s183_s12 }
  0x10   :  { %v86_v5 = vld [vmem:[#allocation6 + $0x50] sm:$0xff]  ;;  %v85_v6 = vld [vmem:[#allocation6 + $0x48] sm:$0xff]  ;;  %v84_v7 = vld [vmem:[#allocation6 + $0x40] sm:$0xff] }
  0x11   :  { %v83_v8 = vld [vmem:[#allocation6 + $0x38] sm:$0xff]  ;;  %v137_v10 = vld [vmem:[#allocation8 + $0x70] sm:$0xff]  ;;  %v136_v12 = vld [vmem:[#allocation8 + $0x68] sm:$0xff] }
  0x12   :  { %v138_v9 = vld [vmem:[#allocation8 + $0x78] sm:$0xff]  ;;  %v82_v11 = vld [vmem:[#allocation6 + $0x30] sm:$0xff]  ;;  %v135_v13 = vld [vmem:[#allocation8 + $0x60] sm:$0xff] }
  0x13   :  { %97 = vmatpush.xpose.msra.mxu0 %v90_v1  ;;  %200 = vmatpush.xpose.msra.mxu2 %v90_v1  ;;  %v81_v14 = vld [vmem:[#allocation6 + $0x28] sm:$0xff]  ;;  %v134_v15 = vld [vmem:[#allocation8 + $0x58] sm:$0xff]  ;;  %v133_v16 = vld [vmem:[#allocation8 + $0x50] sm:$0xff] }
  0x14   :  { %139 = vmatpush.msra.mxu1 %v138_v9  ;;  %v80_v17 = vld [vmem:[#allocation6 + $0x20] sm:$0xff]  ;;  %v132_v18 = vld [vmem:[#allocation8 + $0x48] sm:$0xff]  ;;  %v79_v20 = vld [vmem:[#allocation6 + $0x18] sm:$0xff] }
  0x15   :  { %v131_v19 = vld [vmem:[#allocation8 + $0x40] sm:$0xff]  ;;  %v130_v21 = vld [vmem:[#allocation8 + $0x38] sm:$0xff]  ;;  %v129_v22 = vld [vmem:[#allocation8 + $0x30] sm:$0xff] }
  0x16   :  { %140 = vmatpush.msra.mxu1 %v137_v10  ;;  %v78_v23 = vld [vmem:[#allocation6 + $0x10] sm:$0xff]  ;;  %v128_v24 = vld [vmem:[#allocation8 + $0x28] sm:$0xff]  ;;  %v127_v25 = vld [vmem:[#allocation8 + $0x20] sm:$0xff] }
  0x17   :  { %98 = vmatpush.xpose.msra.mxu0 %v89_v2  ;;  %201 = vmatpush.xpose.msra.mxu2 %v89_v2  ;;  %v77_v26 = vld [vmem:[#allocation6 + $0x8] sm:$0xff]  ;;  %v126_v27 = vld [vmem:[#allocation8 + $0x18] sm:$0xff]  ;;  %v76_v28 = vld [vmem:[#allocation6] sm:$0xff] }
  0x18   :  { %141 = vmatpush.msra.mxu1 %v136_v12  ;;  %v74_v29 = vld [vmem:[#allocation3] sm:$0xff]  ;;  %v75_v30 = vld [vmem:[#allocation3 + $0x8] sm:$0xff]  ;;  %v124_v32 = vld [vmem:[#allocation8 + $0x8] sm:$0xff] }
  0x19   :  { %v125_v31 = vld [vmem:[#allocation8 + $0x10] sm:$0xff]  ;;  %v123_v33 = vld [vmem:[#allocation8] sm:$0xff] }
  0x1a   :  { %142 = vmatpush.msra.mxu1 %v135_v13  ;;  %v221_v34 = vld [vmem:[%s393_s2] ss:$0 sm:$0xff]  ;;  %s185_s2 = sshll.u32 %s396_s5, 4  ;;  %s186_s2 = int_to_ptr.hbm [resolvable:$true] %s185_s2 }
  0x1b   :  { %99 = vmatpush.xpose.msra.mxu0 %v88_v3  ;;  %202 = vmatpush.xpose.msra.mxu2 %v88_v3  ;;  %v222_v41 = vld [vmem:[%s395_s4] ss:$0 sm:$0xff] }
  0x1c   :  { %143 = vmatpush.msra.mxu1 %v134_v15 }
  0x1e   :  { %144 = vmatpush.msra.mxu1 %v133_v16 }
  0x1f   :  { %100 = vmatpush.xpose.msra.mxu0 %v87_v4  ;;  %203 = vmatpush.xpose.msra.mxu2 %v87_v4 }
  0x20   :  { %145 = vmatpush.msra.mxu1 %v132_v18 }
  0x22   :  { %146 = vmatpush.msra.mxu1 %v131_v19 }
  0x23   :  { %101 = vmatpush.xpose.msra.mxu0 %v86_v5  ;;  %204 = vmatpush.xpose.msra.mxu2 %v86_v5 }
  0x24   :  { %147 = vmatpush.msra.mxu1 %v130_v21 }
  0x26   :  { %148 = vmatpush.msra.mxu1 %v129_v22 }
  0x27   :  { %102 = vmatpush.xpose.msra.mxu0 %v85_v6  ;;  %205 = vmatpush.xpose.msra.mxu2 %v85_v6 }
  0x28   :  { %149 = vmatpush.msra.mxu1 %v128_v24 }
  0x2a   :  { %150 = vmatpush.msra.mxu1 %v127_v25 }
  0x2b   :  { %103 = vmatpush.xpose.msra.mxu0 %v84_v7  ;;  %206 = vmatpush.xpose.msra.mxu2 %v84_v7 }
  0x2c   :  { %151 = vmatpush.msra.mxu1 %v126_v27 }
  0x2e   :  { %152 = vmatpush.msra.mxu1 %v125_v31 }
  0x2f   :  { %104 = vmatpush.xpose.msra.mxu0 %v83_v8  ;;  %207 = vmatpush.xpose.msra.mxu2 %v83_v8 }
  0x30   :  { %153 = vmatpush.msra.mxu1 %v124_v32 }
  0x32   :  { %154 = vmatpush.msra.mxu1 %v123_v33 }
  0x33   :  { %105 = vmatpush.xpose.msra.mxu0 %v82_v11  ;;  %208 = vmatpush.xpose.msra.mxu2 %v82_v11 }
  0x37   :  { %106 = vmatpush.xpose.msra.mxu0 %v81_v14  ;;  %209 = vmatpush.xpose.msra.mxu2 %v81_v14 }
  0x3b   :  { %107 = vmatpush.xpose.msra.mxu0 %v80_v17  ;;  %210 = vmatpush.xpose.msra.mxu2 %v80_v17 }
  0x3f   :  { %108 = vmatpush.xpose.msra.mxu0 %v79_v20  ;;  %211 = vmatpush.xpose.msra.mxu2 %v79_v20 }
  0x43   :  { %109 = vmatpush.xpose.msra.mxu0 %v78_v23  ;;  %212 = vmatpush.xpose.msra.mxu2 %v78_v23 }
  0x47   :  { %110 = vmatpush.xpose.msra.mxu0 %v77_v26  ;;  %213 = vmatpush.xpose.msra.mxu2 %v77_v26 }
  0x4b   :  { %111 = vmatpush.xpose.msra.mxu0 %v76_v28  ;;  %214 = vmatpush.xpose.msra.mxu2 %v76_v28 }
  0x4e   :  { %112 = vmatmul.f32.vlgmr.msra.gmra.mxu0 %v74_v29  ;;  %115 = vmatmul.f32.vlgmr.msra.gmra.mxu2 %v75_v30 }
  0xcb   :  { %v113_v35 = vpop.f32.mrf.mxu0 }
  0xcc   :  { %v114_v36 = vadd.f32 %v221_v34, %v113_v35 }
  0xce   :  { %v119_v37 = vmax.f32 %v114_v36, 0.0 }
  0xd0   :  { %155 = vmatmul.f32.vlgmr.msra.gmra.mxu1 %v119_v37 }
  0xd1   :  { %v116_v38 = vpop.f32.mrf.mxu2 }
  0xd2   :  { %v117_v39 = vadd.f32 %v221_v34, %v116_v38 }
  0xd4   :  { %v120_v40 = vmax.f32 %v117_v39, 0.0 }
  0xd8   :  { %158 = vmatmul.f32.gmra.mxu1 %v120_v40 }
 0x14d   :  { %v156_v42 = vpop.f32.mrf.mxu1 }
 0x14e   :  { %v175_v43 = vadd.f32 %v222_v41, %v156_v42 }
 0x150   :  { %177 = vst [vmem:[#allocation9] sm:$0xff] %v175_v43 }
 0x155   :  { %v159_v44 = vpop.f32.mrf.mxu1 }
 0x156   :  { %v176_v45 = vadd.f32 %v222_v41, %v159_v44 }
 0x158   :  { %178 = vst [vmem:[#allocation9 + $0x8] sm:$0xff] %v176_v45 }
 0x159   :  { %191 = dma.vmem_to_hbm [thread:$0]  %s184_s12, 256, %s186_s2, [#allocation5], %s326_s26, %s326_s26, %s327_s27  }
 0x15a   :  { %323 = dma.done.wait [#allocation5], 256  }
 0x15b   :  { %324 = vsyncadd [#allocation5], 4294967040 }
 0x15c   :  { %196 = vsyncpa [#allocation4], 1 }
 0x15d   :  { %197 = vsyncpa [#allocation7], 1 }
 0x15e   :  { %198 = vsyncpa [#allocation5], 1 }

</bundles_post_ra>
